<compile_context>
chip_gen: v7x
topology: tpu7x:2x2x1
jax: 0.10.0
libtpu: 0.0.40
codegen_flags: <defaults>
</compile_context>

<pallas_src>
import jax
import jax.numpy as jnp
from jax import lax
from jax.experimental import pallas as pl
from jax.experimental.pallas import tpu as pltpu


def _round_up(x, m):
    return ((x + m - 1) // m) * m


def _make_kernel(S, TB):
    """Kernel processing one batch tile of TB rows across all S timesteps."""

    def kernel(x_ref, wih_ref, whh_ref, b_ref, w1_ref, b1_ref, w2_ref, b2_ref,
               out_ref, a_ref):
        # x_ref : (S*TB, E)   embedded tokens, time-major within tile (row = t*TB + b)
        # a_ref : (S*TB, H)   scratch: first x@W_ih + b, then overwritten with h_t
        # out_ref: (S*TB, Cp) lane-dense softmax probabilities (padded lanes == 0)
        H = whh_ref.shape[1]

        # Hoisted input projection: ONE big MXU matmul, bias folded in (done once).
        a_ref[...] = (
            jnp.dot(x_ref[...], wih_ref[...], preferred_element_type=jnp.float32)
            + b_ref[...]
        )

        # Recurrence: only h @ W_hh + tanh remain on the serial critical path.
        def step(t, h):
            row = pl.multiple_of(t * TB, TB)
            h_new = jnp.tanh(
                jnp.dot(h, whh_ref[...], preferred_element_type=jnp.float32)
                + a_ref[pl.ds(row, TB), :]
            )
            a_ref[pl.ds(row, TB), :] = h_new      # reuse consumed xW slot for h_t
            return h_new

        lax.fori_loop(0, S, step, jnp.zeros((TB, H), jnp.float32), unroll=True)

        # Dense head as flat 2-D matmuls (M = S*TB rows). Dropout = identity (inference).
        hs = a_ref[...]                                               # (S*TB, H)
        z1 = jnp.maximum(
            jnp.dot(hs, w1_ref[...], preferred_element_type=jnp.float32)
            + b1_ref[...], 0.0)                                       # (S*TB, 64)
        logits = (jnp.dot(z1, w2_ref[...], preferred_element_type=jnp.float32)
                  + b2_ref[...])                                      # (S*TB, Cp)

        # Softmax over classes; padded lanes have logit = -inf -> exp == 0 exactly.
        m = jnp.max(logits, axis=-1, keepdims=True)
        e = jnp.exp(logits - m)
        out_ref[...] = e / jnp.sum(e, axis=-1, keepdims=True)

    return kernel


def word_tagging_rnn_forward(token_ids, params):
    """token_ids: (B, S) int32 -> (B, S, num_classes) f32 softmax probabilities."""
    B, S = token_ids.shape
    E = params["embedding"].shape[1]
    H = params["W_hh"].shape[0]
    D1 = params["W1"].shape[1]
    C = params["W2"].shape[1]
    C_pad = max(128, _round_up(C, 128))          # lane-dense output width

    # Batch tiling: one grid program per TB rows (independent recurrences -> megacore).
    TB = min(_round_up(B, 8), 128)
    B_pad = _round_up(B, TB)
    n_bt = B_pad // TB

    # Gather embeddings directly in time-major order (no (B,S,E) transpose round-trip).
    x = jnp.take(params["embedding"], token_ids.T, axis=0).astype(jnp.float32)  # (S,B,E)
    x = jnp.pad(x, ((0, 0), (0, B_pad - B), (0, 0)))
    # -> (n_bt, S*TB, E) with row index within a tile = t*TB + b
    x = x.reshape(S, n_bt, TB, E).transpose(1, 0, 2, 3).reshape(n_bt, S * TB, E)

    # Pad classifier to lane-dense width: zero weight columns, -inf bias on padded lanes.
    w2p = jnp.pad(params["W2"], ((0, 0), (0, C_pad - C)))
    b2p = jnp.concatenate(
        [params["b2"], jnp.full((1, C_pad - C), -jnp.inf, jnp.float32)], axis=1)

    full2d = lambda shape: pl.BlockSpec(shape, lambda i: (0, 0))

    flops = 2 * n_bt * S * TB * (E * H + H * H + H * D1 + D1 * C_pad)
    transcendentals = n_bt * S * TB * (H + C_pad)
    bytes_accessed = 4 * (n_bt * S * TB * (E + C_pad)
                          + E * H + H * H + H + H * D1 + D1 + D1 * C_pad + C_pad)

    vmem_est = 4 * (2 * S * TB * (E + C_pad) + S * TB * H
                    + 2 * (E * H + H * H + H + H * D1 + D1 + D1 * C_pad + C_pad))
    vmem_limit = min(max(2 * vmem_est, 4 * 1024 * 1024), 32 * 1024 * 1024)

    out = pl.pallas_call(
        _make_kernel(S, TB),
        out_shape=jax.ShapeDtypeStruct((n_bt, S * TB, C_pad), jnp.float32),
        grid=(n_bt,),
        in_specs=[
            pl.BlockSpec((pl.Squeezed(), S * TB, E), lambda i: (i, 0, 0)),
            full2d((E, H)),          # W_ih
            full2d((H, H)),          # W_hh
            full2d((1, H)),          # b_ih + b_hh
            full2d((H, D1)),         # W1
            full2d((1, D1)),         # b1
            full2d((D1, C_pad)),     # W2 (zero-padded cols)
            full2d((1, C_pad)),      # b2 (-inf padded lanes)
        ],
        out_specs=pl.BlockSpec((pl.Squeezed(), S * TB, C_pad), lambda i: (i, 0, 0)),
        scratch_shapes=[pltpu.VMEM((S * TB, H), jnp.float32)],
        compiler_params=pltpu.CompilerParams(
            dimension_semantics=("parallel",),     # batch tiles are independent
            vmem_limit_bytes=vmem_limit),
        cost_estimate=pl.CostEstimate(
            flops=flops, transcendentals=transcendentals,
            bytes_accessed=bytes_accessed),
    )(x, params["W_ih"], params["W_hh"], params["b_rnn"],
      params["W1"], params["b1"], w2p, b2p)

    # (n_bt, S*TB, C_pad) -> (B, S, C)
    out = out.reshape(n_bt, S, TB, C_pad).transpose(1, 0, 2, 3).reshape(S, B_pad, C_pad)
    return jnp.transpose(out[:, :B, :C], (1, 0, 2))


def reference_forward(token_ids, params):
    """Pure-JAX reference mirroring the PyTorch module (inference)."""
    emb = jnp.take(params["embedding"], token_ids, axis=0)      # (B, S, E)
    B, S, _ = emb.shape
    H = params["W_hh"].shape[0]

    def step(h, x_t):
        h_new = jnp.tanh(x_t @ params["W_ih"] + h @ params["W_hh"]
                         + params["b_rnn"][0])
        return h_new, h_new

    x_sm = jnp.transpose(emb, (1, 0, 2))                        # (S, B, E)
    _, hs = lax.scan(step, jnp.zeros((B, H), jnp.float32), x_sm)
    hs = jnp.transpose(hs, (1, 0, 2))                           # (B, S, H)
    z1 = jnp.maximum(hs @ params["W1"] + params["b1"][0], 0.0)
    logits = z1 @ params["W2"] + params["b2"][0]
    return jax.nn.softmax(logits, axis=2)


def make_params(key, vocab_size, embedding_dim, hidden, dense_dim, num_classes):
    keys = jax.random.split(key, 8)
    s = 0.1
    return {
        "embedding": s * jax.random.normal(keys[0], (vocab_size, embedding_dim), jnp.float32),
        # RNN weights stored pre-transposed relative to torch (weight_ih_l0 is (H, E)).
        "W_ih": s * jax.random.normal(keys[1], (embedding_dim, hidden), jnp.float32),
        "W_hh": s * jax.random.normal(keys[2], (hidden, hidden), jnp.float32),
        "b_rnn": s * jax.random.normal(keys[3], (1, hidden), jnp.float32),  # b_ih + b_hh combined
        "W1": s * jax.random.normal(keys[4], (hidden, dense_dim), jnp.float32),
        "b1": s * jax.random.normal(keys[5], (1, dense_dim), jnp.float32),
        "W2": s * jax.random.normal(keys[6], (dense_dim, num_classes), jnp.float32),
        "b2": s * jax.random.normal(keys[7], (1, num_classes), jnp.float32),
    }


if __name__ == "__main__":
    VOCAB = 50
    EMB = 32
    HIDDEN = 128        # fixed by the module (nn.RNN(embedding_dim, 128))
    DENSE = 64          # fixed by the module (nn.Linear(rnn_output_dim, 64))
    NUM_CLASSES = 8
    B, S = 2, 8

    key = jax.random.PRNGKey(0)
    k_tok, k_par = jax.random.split(key)
    token_ids = jax.random.randint(k_tok, (B, S), 0, VOCAB, dtype=jnp.int32)
    params = make_params(k_par, VOCAB, EMB, HIDDEN, DENSE, NUM_CLASSES)

    out = word_tagging_rnn_forward(token_ids, params)
    out = jax.block_until_ready(out)

    ref = jax.block_until_ready(reference_forward(token_ids, params))
    assert out.shape == (B, S, NUM_CLASSES)
    assert jnp.allclose(out, ref, atol=1e-5, rtol=1e-5), "mismatch vs reference"
    assert jnp.allclose(jnp.sum(out, axis=-1), 1.0, atol=1e-5), "softmax rows must sum to 1"

    print("KERNEL_OK")
</pallas_src>

<mosaic_0001>
module attributes {stable_mosaic.version = 11 : i64} {
  func.func @kernel(%arg0: i32, %arg1: memref<1x64x32xf32, #tpu.memory_space<vmem>>, %arg2: memref<32x128xf32, #tpu.memory_space<vmem>>, %arg3: memref<128x128xf32, #tpu.memory_space<vmem>>, %arg4: memref<1x128xf32, #tpu.memory_space<vmem>>, %arg5: memref<128x64xf32, #tpu.memory_space<vmem>>, %arg6: memref<1x64xf32, #tpu.memory_space<vmem>>, %arg7: memref<64x128xf32, #tpu.memory_space<vmem>>, %arg8: memref<1x128xf32, #tpu.memory_space<vmem>>, %arg9: memref<1x64x128xf32, #tpu.memory_space<vmem>>, %arg10: memref<64x128xf32, #tpu.memory_space<vmem>>) attributes {dimension_semantics = [#tpu.dimension_semantics<parallel>], iteration_bounds = array<i64: 1>, scalar_prefetch = 0 : i64, scratch_operands = 1 : i64, tpu.core_type = #tpu.core_type<tc>, window_params = [{transform_indices = @transform_0, window_bounds = array<i64: 1, 64, 32>}, {pipeline_mode = #tpu.pipeline_mode<synchronous>, transform_indices = @transform_1, window_bounds = array<i64: 32, 128>}, {pipeline_mode = #tpu.pipeline_mode<synchronous>, transform_indices = @transform_2, window_bounds = array<i64: 128, 128>}, {pipeline_mode = #tpu.pipeline_mode<synchronous>, transform_indices = @transform_3, window_bounds = array<i64: 1, 128>}, {pipeline_mode = #tpu.pipeline_mode<synchronous>, transform_indices = @transform_4, window_bounds = array<i64: 128, 64>}, {pipeline_mode = #tpu.pipeline_mode<synchronous>, transform_indices = @transform_5, window_bounds = array<i64: 1, 64>}, {pipeline_mode = #tpu.pipeline_mode<synchronous>, transform_indices = @transform_6, window_bounds = array<i64: 64, 128>}, {pipeline_mode = #tpu.pipeline_mode<synchronous>, transform_indices = @transform_7, window_bounds = array<i64: 1, 128>}, {transform_indices = @transform_8, window_bounds = array<i64: 1, 64, 128>}]} {
    %c0 = arith.constant 0 : index
    %c0_0 = arith.constant 0 : index
    %c0_1 = arith.constant 0 : index
    %0 = vector.load %arg1[%c0, %c0_0, %c0_1] : memref<1x64x32xf32, #tpu.memory_space<vmem>>, vector<1x64x32xf32>
    %1 = vector.shape_cast %0 : vector<1x64x32xf32> to vector<64x32xf32>
    %c0_2 = arith.constant 0 : index
    %c0_3 = arith.constant 0 : index
    %2 = vector.load %arg2[%c0_2, %c0_3] : memref<32x128xf32, #tpu.memory_space<vmem>>, vector<32x128xf32>
    %cst = arith.constant dense<0.000000e+00> : vector<64x128xf32>
    %3 = tpu.matmul %1, %2, %cst {dimension_numbers = #tpu.dot_dimension_numbers<[1], [0], [0], [1], [0, 0, 1, 1], [], []>} : vector<64x32xf32>, vector<32x128xf32>, vector<64x128xf32> -> vector<64x128xf32>
    %c0_4 = arith.constant 0 : index
    %c0_5 = arith.constant 0 : index
    %4 = vector.load %arg4[%c0_4, %c0_5] : memref<1x128xf32, #tpu.memory_space<vmem>>, vector<1x128xf32>
    %5 = vector.broadcast %4 : vector<1x128xf32> to vector<64x128xf32>
    %6 = arith.addf %3, %5 : vector<64x128xf32>
    %c0_6 = arith.constant 0 : index
    %c0_7 = arith.constant 0 : index
    %7 = vector.load %arg10[%c0_6, %c0_7] : memref<64x128xf32, #tpu.memory_space<vmem>>, vector<64x128xf32>
    tpu.vector_store %arg10[%c0_6, %c0_7], %6 {strides = array<i32>} : memref<64x128xf32, #tpu.memory_space<vmem>>, vector<64x128xf32>,
    %cst_8 = arith.constant 0.000000e+00 : f32
    %8 = vector.broadcast %cst_8 : f32 to vector<8x128xf32>
    %c0_i32 = arith.constant 0 : i32
    %c8_i32 = arith.constant 8 : i32
    %9 = arith.muli %c0_i32, %c8_i32 : i32
    %10 = tpu.assume_multiple %9, 8 : i32
    %c0_9 = arith.constant 0 : index
    %c0_10 = arith.constant 0 : index
    %11 = vector.load %arg3[%c0_9, %c0_10] : memref<128x128xf32, #tpu.memory_space<vmem>>, vector<128x128xf32>
    %cst_11 = arith.constant dense<0.000000e+00> : vector<8x128xf32>
    %12 = tpu.matmul %8, %11, %cst_11 {dimension_numbers = #tpu.dot_dimension_numbers<[1], [0], [0], [1], [0, 0, 1, 1], [], []>} : vector<8x128xf32>, vector<128x128xf32>, vector<8x128xf32> -> vector<8x128xf32>
    %13 = arith.index_cast %10 : i32 to index
    %c0_12 = arith.constant 0 : index
    %14 = vector.load %arg10[%13, %c0_12] : memref<64x128xf32, #tpu.memory_space<vmem>>, vector<8x128xf32>
    %15 = arith.addf %12, %14 : vector<8x128xf32>
    %16 = math.tanh %15 : vector<8x128xf32>
    %17 = arith.index_cast %10 : i32 to index
    %c0_13 = arith.constant 0 : index
    %18 = vector.load %arg10[%17, %c0_13] : memref<64x128xf32, #tpu.memory_space<vmem>>, vector<8x128xf32>
    tpu.vector_store %arg10[%17, %c0_13], %16 {strides = array<i32>} : memref<64x128xf32, #tpu.memory_space<vmem>>, vector<8x128xf32>,
    %c1_i32 = arith.constant 1 : i32
    %c8_i32_14 = arith.constant 8 : i32
    %19 = arith.muli %c1_i32, %c8_i32_14 : i32
    %20 = tpu.assume_multiple %19, 8 : i32
    %c0_15 = arith.constant 0 : index
    %c0_16 = arith.constant 0 : index
    %21 = vector.load %arg3[%c0_15, %c0_16] : memref<128x128xf32, #tpu.memory_space<vmem>>, vector<128x128xf32>
    %cst_17 = arith.constant dense<0.000000e+00> : vector<8x128xf32>
    %22 = tpu.matmul %16, %21, %cst_17 {dimension_numbers = #tpu.dot_dimension_numbers<[1], [0], [0], [1], [0, 0, 1, 1], [], []>} : vector<8x128xf32>, vector<128x128xf32>, vector<8x128xf32> -> vector<8x128xf32>
    %23 = arith.index_cast %20 : i32 to index
    %c0_18 = arith.constant 0 : index
    %24 = vector.load %arg10[%23, %c0_18] : memref<64x128xf32, #tpu.memory_space<vmem>>, vector<8x128xf32>
    %25 = arith.addf %22, %24 : vector<8x128xf32>
    %26 = math.tanh %25 : vector<8x128xf32>
    %27 = arith.index_cast %20 : i32 to index
    %c0_19 = arith.constant 0 : index
    %28 = vector.load %arg10[%27, %c0_19] : memref<64x128xf32, #tpu.memory_space<vmem>>, vector<8x128xf32>
    tpu.vector_store %arg10[%27, %c0_19], %26 {strides = array<i32>} : memref<64x128xf32, #tpu.memory_space<vmem>>, vector<8x128xf32>,
    %c2_i32 = arith.constant 2 : i32
    %c8_i32_20 = arith.constant 8 : i32
    %29 = arith.muli %c2_i32, %c8_i32_20 : i32
    %30 = tpu.assume_multiple %29, 8 : i32
    %c0_21 = arith.constant 0 : index
    %c0_22 = arith.constant 0 : index
    %31 = vector.load %arg3[%c0_21, %c0_22] : memref<128x128xf32, #tpu.memory_space<vmem>>, vector<128x128xf32>
    %cst_23 = arith.constant dense<0.000000e+00> : vector<8x128xf32>
    %32 = tpu.matmul %26, %31, %cst_23 {dimension_numbers = #tpu.dot_dimension_numbers<[1], [0], [0], [1], [0, 0, 1, 1], [], []>} : vector<8x128xf32>, vector<128x128xf32>, vector<8x128xf32> -> vector<8x128xf32>
    %33 = arith.index_cast %30 : i32 to index
    %c0_24 = arith.constant 0 : index
    %34 = vector.load %arg10[%33, %c0_24] : memref<64x128xf32, #tpu.memory_space<vmem>>, vector<8x128xf32>
    %35 = arith.addf %32, %34 : vector<8x128xf32>
    %36 = math.tanh %35 : vector<8x128xf32>
    %37 = arith.index_cast %30 : i32 to index
    %c0_25 = arith.constant 0 : index
    %38 = vector.load %arg10[%37, %c0_25] : memref<64x128xf32, #tpu.memory_space<vmem>>, vector<8x128xf32>
    tpu.vector_store %arg10[%37, %c0_25], %36 {strides = array<i32>} : memref<64x128xf32, #tpu.memory_space<vmem>>, vector<8x128xf32>,
    %c3_i32 = arith.constant 3 : i32
    %c8_i32_26 = arith.constant 8 : i32
    %39 = arith.muli %c3_i32, %c8_i32_26 : i32
    %40 = tpu.assume_multiple %39, 8 : i32
    %c0_27 = arith.constant 0 : index
    %c0_28 = arith.constant 0 : index
    %41 = vector.load %arg3[%c0_27, %c0_28] : memref<128x128xf32, #tpu.memory_space<vmem>>, vector<128x128xf32>
    %cst_29 = arith.constant dense<0.000000e+00> : vector<8x128xf32>
    %42 = tpu.matmul %36, %41, %cst_29 {dimension_numbers = #tpu.dot_dimension_numbers<[1], [0], [0], [1], [0, 0, 1, 1], [], []>} : vector<8x128xf32>, vector<128x128xf32>, vector<8x128xf32> -> vector<8x128xf32>
    %43 = arith.index_cast %40 : i32 to index
    %c0_30 = arith.constant 0 : index
    %44 = vector.load %arg10[%43, %c0_30] : memref<64x128xf32, #tpu.memory_space<vmem>>, vector<8x128xf32>
    %45 = arith.addf %42, %44 : vector<8x128xf32>
    %46 = math.tanh %45 : vector<8x128xf32>
    %47 = arith.index_cast %40 : i32 to index
    %c0_31 = arith.constant 0 : index
    %48 = vector.load %arg10[%47, %c0_31] : memref<64x128xf32, #tpu.memory_space<vmem>>, vector<8x128xf32>
    tpu.vector_store %arg10[%47, %c0_31], %46 {strides = array<i32>} : memref<64x128xf32, #tpu.memory_space<vmem>>, vector<8x128xf32>,
    %c4_i32 = arith.constant 4 : i32
    %c8_i32_32 = arith.constant 8 : i32
    %49 = arith.muli %c4_i32, %c8_i32_32 : i32
    %50 = tpu.assume_multiple %49, 8 : i32
    %c0_33 = arith.constant 0 : index
    %c0_34 = arith.constant 0 : index
    %51 = vector.load %arg3[%c0_33, %c0_34] : memref<128x128xf32, #tpu.memory_space<vmem>>, vector<128x128xf32>
    %cst_35 = arith.constant dense<0.000000e+00> : vector<8x128xf32>
    %52 = tpu.matmul %46, %51, %cst_35 {dimension_numbers = #tpu.dot_dimension_numbers<[1], [0], [0], [1], [0, 0, 1, 1], [], []>} : vector<8x128xf32>, vector<128x128xf32>, vector<8x128xf32> -> vector<8x128xf32>
    %53 = arith.index_cast %50 : i32 to index
    %c0_36 = arith.constant 0 : index
    %54 = vector.load %arg10[%53, %c0_36] : memref<64x128xf32, #tpu.memory_space<vmem>>, vector<8x128xf32>
    %55 = arith.addf %52, %54 : vector<8x128xf32>
    %56 = math.tanh %55 : vector<8x128xf32>
    %57 = arith.index_cast %50 : i32 to index
    %c0_37 = arith.constant 0 : index
    %58 = vector.load %arg10[%57, %c0_37] : memref<64x128xf32, #tpu.memory_space<vmem>>, vector<8x128xf32>
    tpu.vector_store %arg10[%57, %c0_37], %56 {strides = array<i32>} : memref<64x128xf32, #tpu.memory_space<vmem>>, vector<8x128xf32>,
    %c5_i32 = arith.constant 5 : i32
    %c8_i32_38 = arith.constant 8 : i32
    %59 = arith.muli %c5_i32, %c8_i32_38 : i32
    %60 = tpu.assume_multiple %59, 8 : i32
    %c0_39 = arith.constant 0 : index
    %c0_40 = arith.constant 0 : index
    %61 = vector.load %arg3[%c0_39, %c0_40] : memref<128x128xf32, #tpu.memory_space<vmem>>, vector<128x128xf32>
    %cst_41 = arith.constant dense<0.000000e+00> : vector<8x128xf32>
    %62 = tpu.matmul %56, %61, %cst_41 {dimension_numbers = #tpu.dot_dimension_numbers<[1], [0], [0], [1], [0, 0, 1, 1], [], []>} : vector<8x128xf32>, vector<128x128xf32>, vector<8x128xf32> -> vector<8x128xf32>
    %63 = arith.index_cast %60 : i32 to index
    %c0_42 = arith.constant 0 : index
    %64 = vector.load %arg10[%63, %c0_42] : memref<64x128xf32, #tpu.memory_space<vmem>>, vector<8x128xf32>
    %65 = arith.addf %62, %64 : vector<8x128xf32>
    %66 = math.tanh %65 : vector<8x128xf32>
    %67 = arith.index_cast %60 : i32 to index
    %c0_43 = arith.constant 0 : index
    %68 = vector.load %arg10[%67, %c0_43] : memref<64x128xf32, #tpu.memory_space<vmem>>, vector<8x128xf32>
    tpu.vector_store %arg10[%67, %c0_43], %66 {strides = array<i32>} : memref<64x128xf32, #tpu.memory_space<vmem>>, vector<8x128xf32>,
    %c6_i32 = arith.constant 6 : i32
    %c8_i32_44 = arith.constant 8 : i32
    %69 = arith.muli %c6_i32, %c8_i32_44 : i32
    %70 = tpu.assume_multiple %69, 8 : i32
    %c0_45 = arith.constant 0 : index
    %c0_46 = arith.constant 0 : index
    %71 = vector.load %arg3[%c0_45, %c0_46] : memref<128x128xf32, #tpu.memory_space<vmem>>, vector<128x128xf32>
    %cst_47 = arith.constant dense<0.000000e+00> : vector<8x128xf32>
    %72 = tpu.matmul %66, %71, %cst_47 {dimension_numbers = #tpu.dot_dimension_numbers<[1], [0], [0], [1], [0, 0, 1, 1], [], []>} : vector<8x128xf32>, vector<128x128xf32>, vector<8x128xf32> -> vector<8x128xf32>
    %73 = arith.index_cast %70 : i32 to index
    %c0_48 = arith.constant 0 : index
    %74 = vector.load %arg10[%73, %c0_48] : memref<64x128xf32, #tpu.memory_space<vmem>>, vector<8x128xf32>
    %75 = arith.addf %72, %74 : vector<8x128xf32>
    %76 = math.tanh %75 : vector<8x128xf32>
    %77 = arith.index_cast %70 : i32 to index
    %c0_49 = arith.constant 0 : index
    %78 = vector.load %arg10[%77, %c0_49] : memref<64x128xf32, #tpu.memory_space<vmem>>, vector<8x128xf32>
    tpu.vector_store %arg10[%77, %c0_49], %76 {strides = array<i32>} : memref<64x128xf32, #tpu.memory_space<vmem>>, vector<8x128xf32>,
    %c7_i32 = arith.constant 7 : i32
    %c8_i32_50 = arith.constant 8 : i32
    %79 = arith.muli %c7_i32, %c8_i32_50 : i32
    %80 = tpu.assume_multiple %79, 8 : i32
    %c0_51 = arith.constant 0 : index
    %c0_52 = arith.constant 0 : index
    %81 = vector.load %arg3[%c0_51, %c0_52] : memref<128x128xf32, #tpu.memory_space<vmem>>, vector<128x128xf32>
    %cst_53 = arith.constant dense<0.000000e+00> : vector<8x128xf32>
    %82 = tpu.matmul %76, %81, %cst_53 {dimension_numbers = #tpu.dot_dimension_numbers<[1], [0], [0], [1], [0, 0, 1, 1], [], []>} : vector<8x128xf32>, vector<128x128xf32>, vector<8x128xf32> -> vector<8x128xf32>
    %83 = arith.index_cast %80 : i32 to index
    %c0_54 = arith.constant 0 : index
    %84 = vector.load %arg10[%83, %c0_54] : memref<64x128xf32, #tpu.memory_space<vmem>>, vector<8x128xf32>
    %85 = arith.addf %82, %84 : vector<8x128xf32>
    %86 = math.tanh %85 : vector<8x128xf32>
    %87 = arith.index_cast %80 : i32 to index
    %c0_55 = arith.constant 0 : index
    %88 = vector.load %arg10[%87, %c0_55] : memref<64x128xf32, #tpu.memory_space<vmem>>, vector<8x128xf32>
    tpu.vector_store %arg10[%87, %c0_55], %86 {strides = array<i32>} : memref<64x128xf32, #tpu.memory_space<vmem>>, vector<8x128xf32>,
    %c8_i32_56 = arith.constant 8 : i32
    %c0_57 = arith.constant 0 : index
    %c0_58 = arith.constant 0 : index
    %89 = vector.load %arg10[%c0_57, %c0_58] : memref<64x128xf32, #tpu.memory_space<vmem>>, vector<64x128xf32>
    %c0_59 = arith.constant 0 : index
    %c0_60 = arith.constant 0 : index
    %90 = vector.load %arg5[%c0_59, %c0_60] : memref<128x64xf32, #tpu.memory_space<vmem>>, vector<128x64xf32>
    %cst_61 = arith.constant dense<0.000000e+00> : vector<64x64xf32>
    %91 = tpu.matmul %89, %90, %cst_61 {dimension_numbers = #tpu.dot_dimension_numbers<[1], [0], [0], [1], [0, 0, 1, 1], [], []>} : vector<64x128xf32>, vector<128x64xf32>, vector<64x64xf32> -> vector<64x64xf32>
    %c0_62 = arith.constant 0 : index
    %c0_63 = arith.constant 0 : index
    %92 = vector.load %arg6[%c0_62, %c0_63] : memref<1x64xf32, #tpu.memory_space<vmem>>, vector<1x64xf32>
    %93 = vector.broadcast %92 : vector<1x64xf32> to vector<64x64xf32>
    %94 = arith.addf %91, %93 : vector<64x64xf32>
    %cst_64 = arith.constant 0.000000e+00 : f32
    %95 = vector.broadcast %cst_64 : f32 to vector<64x64xf32>
    %96 = arith.maximumf %94, %95 : vector<64x64xf32>
    %c0_65 = arith.constant 0 : index
    %c0_66 = arith.constant 0 : index
    %97 = vector.load %arg7[%c0_65, %c0_66] : memref<64x128xf32, #tpu.memory_space<vmem>>, vector<64x128xf32>
    %cst_67 = arith.constant dense<0.000000e+00> : vector<64x128xf32>
    %98 = tpu.matmul %96, %97, %cst_67 {dimension_numbers = #tpu.dot_dimension_numbers<[1], [0], [0], [1], [0, 0, 1, 1], [], []>} : vector<64x64xf32>, vector<64x128xf32>, vector<64x128xf32> -> vector<64x128xf32>
    %c0_68 = arith.constant 0 : index
    %c0_69 = arith.constant 0 : index
    %99 = vector.load %arg8[%c0_68, %c0_69] : memref<1x128xf32, #tpu.memory_space<vmem>>, vector<1x128xf32>
    %100 = vector.broadcast %99 : vector<1x128xf32> to vector<64x128xf32>
    %101 = arith.addf %98, %100 : vector<64x128xf32>
    %cst_70 = arith.constant dense<0xFF800000> : vector<64xf32>
    %102 = vector.multi_reduction <maximumf>, %101, %cst_70 [1] : vector<64x128xf32> to vector<64xf32>
    %103 = vector.shape_cast %102 : vector<64xf32> to vector<64x1xf32>
    %104 = vector.broadcast %103 : vector<64x1xf32> to vector<64x128xf32>
    %105 = arith.subf %101, %104 : vector<64x128xf32>
    %106 = math.exp %105 : vector<64x128xf32>
    %cst_71 = arith.constant dense<0.000000e+00> : vector<64xf32>
    %107 = vector.multi_reduction <add>, %106, %cst_71 [1] : vector<64x128xf32> to vector<64xf32>
    %108 = vector.shape_cast %107 : vector<64xf32> to vector<64x1xf32>
    %109 = vector.broadcast %108 : vector<64x1xf32> to vector<64x128xf32>
    %110 = arith.divf %106, %109 : vector<64x128xf32>
    %c0_72 = arith.constant 0 : index
    %c0_73 = arith.constant 0 : index
    %c0_74 = arith.constant 0 : index
    %111 = vector.load %arg9[%c0_72, %c0_73, %c0_74] : memref<1x64x128xf32, #tpu.memory_space<vmem>>, vector<1x64x128xf32>
    %112 = vector.shape_cast %111 : vector<1x64x128xf32> to vector<64x128xf32>
    %113 = vector.shape_cast %110 : vector<64x128xf32> to vector<1x64x128xf32>
    tpu.vector_store %arg9[%c0_72, %c0_73, %c0_74], %113 {strides = array<i32>} : memref<1x64x128xf32, #tpu.memory_space<vmem>>, vector<1x64x128xf32>,
    return
  }
  func.func @transform_0(%arg0: i32) -> (i32, i32, i32) {
    %c0_i32 = arith.constant 0 : i32
    %c0_i32_0 = arith.constant 0 : i32
    %c0_i32_1 = arith.constant 0 : i32
    return %arg0, %c0_i32, %c0_i32_0 : i32, i32, i32
  }
  func.func @transform_1(%arg0: i32) -> (i32, i32) {
    %c0_i32 = arith.constant 0 : i32
    %c0_i32_0 = arith.constant 0 : i32
    %c0_i32_1 = arith.constant 0 : i32
    return %c0_i32, %c0_i32_0 : i32, i32
  }
  func.func @transform_2(%arg0: i32) -> (i32, i32) {
    %c0_i32 = arith.constant 0 : i32
    %c0_i32_0 = arith.constant 0 : i32
    %c0_i32_1 = arith.constant 0 : i32
    return %c0_i32, %c0_i32_0 : i32, i32
  }
  func.func @transform_3(%arg0: i32) -> (i32, i32) {
    %c0_i32 = arith.constant 0 : i32
    %c0_i32_0 = arith.constant 0 : i32
    %c0_i32_1 = arith.constant 0 : i32
    return %c0_i32, %c0_i32_0 : i32, i32
  }
  func.func @transform_4(%arg0: i32) -> (i32, i32) {
    %c0_i32 = arith.constant 0 : i32
    %c0_i32_0 = arith.constant 0 : i32
    %c0_i32_1 = arith.constant 0 : i32
    return %c0_i32, %c0_i32_0 : i32, i32
  }
  func.func @transform_5(%arg0: i32) -> (i32, i32) {
    %c0_i32 = arith.constant 0 : i32
    %c0_i32_0 = arith.constant 0 : i32
    %c0_i32_1 = arith.constant 0 : i32
    return %c0_i32, %c0_i32_0 : i32, i32
  }
  func.func @transform_6(%arg0: i32) -> (i32, i32) {
    %c0_i32 = arith.constant 0 : i32
    %c0_i32_0 = arith.constant 0 : i32
    %c0_i32_1 = arith.constant 0 : i32
    return %c0_i32, %c0_i32_0 : i32, i32
  }
  func.func @transform_7(%arg0: i32) -> (i32, i32) {
    %c0_i32 = arith.constant 0 : i32
    %c0_i32_0 = arith.constant 0 : i32
    %c0_i32_1 = arith.constant 0 : i32
    return %c0_i32, %c0_i32_0 : i32, i32
  }
  func.func @transform_8(%arg0: i32) -> (i32, i32, i32) {
    %c0_i32 = arith.constant 0 : i32
    %c0_i32_0 = arith.constant 0 : i32
    %c0_i32_1 = arith.constant 0 : i32
    return %arg0, %c0_i32, %c0_i32_0 : i32, i32, i32
  }
}

</mosaic_0001>

<bundles_post_ra>
// kernel: tpu_custom_call.1
= control target key start
LH: loop header
LB: loop body
LE: loop exit
PB: predicated region body
PF: predicated region fallthrough
CT: control target
= control target key end

     0   :  { %v2196_v3 = vmov 0.0|0.0   ;;  %vm2197_vm0 = vmmov 0   ;;  %v2198_v6 = vmov 0.0   ;;  %vm49_vm1 = vcmask 261120   ;;  %s2643_s0 = inlined_call_operand.vmem [shape: f32[1,64,32], index: 0, kind: input, shape index: {}]   ;;  %s2644_s1 = inlined_call_operand.vmem [shape: f32[32,128], index: 1, kind: input, shape index: {}]   ;;  %s2645_s2 = inlined_call_operand.vmem [shape: f32[128,128], index: 2, kind: input, shape index: {}]   ;;  %s2646_s3 = inlined_call_operand.vmem [shape: f32[1,128], index: 3, kind: input, shape index: {}]   ;;  %s2647_s4 = inlined_call_operand.vmem [shape: f32[128,64], index: 4, kind: input, shape index: {}]   ;;  %s2648_s5 = inlined_call_operand.vmem [shape: f32[1,64], index: 5, kind: input, shape index: {}]   ;;  %s2649_s6 = inlined_call_operand.vmem [shape: f32[64,128], index: 6, kind: input, shape index: {}]   ;;  %s2650_s7 = inlined_call_operand.vmem [shape: f32[1,128], index: 7, kind: input, shape index: {}]   ;;  %s2651_s8 = inlined_call_operand.hbm [shape: f32[1,64,128], index: 8, kind: output, shape index: {}]  }
   0x1   :  { %v187_v0 = vld [vmem:[%s2645_s2] sm:$0xff]  ;;  %v188_v1 = vld [vmem:[%s2645_s2 + $0x8] sm:$0xff]  ;;  %v189_v2 = vld [vmem:[%s2645_s2 + $0x10] sm:$0xff]  ;;  %1878 = vmatprep.subr.bf16.mxu1 %v2196_v3  ;;  %1550 = vmatprep.mubr.msk.f32.mxu1 %vm2197_vm0, %v2198_v6 }
   0x2   :  { %v2257_v4 = vpack.c.bf16 %v188_v1, %v187_v0  ;;  %v190_v5 = vld [vmem:[%s2645_s2 + $0x18] sm:$0xff]  ;;  %v38_v8 = vld [vmem:[%s2644_s1] sm:$0xff]  ;;  %v39_v9 = vld [vmem:[%s2644_s1 + $0x8] sm:$0xff] }
   0x3   :  { %v2265_v7 = vpack.c.bf16 %v190_v5, %v189_v2  ;;  %v191_v10 = vld [vmem:[%s2645_s2 + $0x20] sm:$0xff]  ;;  %v192_v11 = vld [vmem:[%s2645_s2 + $0x28] sm:$0xff]  ;;  %v1870_v12 = vpack.c.bf16 %v39_v9, %v38_v8  ;;  %v40_v13 = vld [vmem:[%s2644_s1 + $0x10] sm:$0xff] }
   0x4   :  { %1880 = vmatpush3.bf16.msra.mxu1 %v2257_v4  ;;  %v41_v14 = vld [vmem:[%s2644_s1 + $0x18] sm:$0xff]  ;;  %v30_v16 = vld [vmem:[%s2643_s0] sm:$0xff]  ;;  %v2290_v17 = vpack.c.bf16 %v192_v11, %v191_v10 }
   0x5   :  { %1881 = vmatprep.subr.bf16.mxu1 %v2196_v3  ;;  %1871 = vmatprep.subr.bf16.mxu0 %v1870_v12  ;;  %v1874_v15 = vpack.c.bf16 %v41_v14, %v40_v13 }
   0x6   :  { %1873 = vmatpush3.bf16.msra.mxu0 %v1870_v12 }
   0x8   :  { %1883 = vmatpush3.bf16.msra.mxu1 %v2265_v7 }
   0x9   :  { %13 = vsyncpa [#allocation4], 0  ;;  %1884 = vmatprep.subr.bf16.mxu1 %v2196_v3  ;;  %v193_v18 = vld [vmem:[%s2645_s2 + $0x30] sm:$0xff]  ;;  %v194_v19 = vld [vmem:[%s2645_s2 + $0x38] sm:$0xff]  ;;  %1875 = vmatprep.subr.bf16.mxu0 %v1874_v15  ;;  %vm1065_vm2 = vcmask 523264  }
   0xa   :  { %1506 = vmatprep.mubr.msk.f32.mxu0 %vm49_vm1, %v30_v16  ;;  %v2301_v20 = vpack.c.bf16 %v194_v19, %v193_v18  ;;  %1877 = vmatpush3.bf16.msra.mxu0 %v1874_v15  ;;  %v31_v21 = vld [vmem:[%s2643_s0 + $0x8] sm:$0xff]  ;;  %v195_v22 = vld [vmem:[%s2645_s2 + $0x40] sm:$0xff]  ;;  %v197_v25 = vld [vmem:[%s2645_s2 + $0x50] sm:$0xff] }
   0xb   :  { %v196_v23 = vld [vmem:[%s2645_s2 + $0x48] sm:$0xff]  ;;  %1902 = vmatprep.subr.bf16.mxu0 %v2196_v3  ;;  %v198_v26 = vld [vmem:[%s2645_s2 + $0x58] sm:$0xff]  ;;  %v199_v28 = vld [vmem:[%s2645_s2 + $0x60] sm:$0xff] }
   0xc   :  { %1886 = vmatpush3.bf16.msra.mxu1 %v2290_v17  ;;  %v2316_v24 = vpack.c.bf16 %v196_v23, %v195_v22  ;;  %v2328_v27 = vpack.c.bf16 %v198_v26, %v197_v25  ;;  %v200_v29 = vld [vmem:[%s2645_s2 + $0x68] sm:$0xff]  ;;  %v201_v31 = vld [vmem:[%s2645_s2 + $0x70] sm:$0xff]  ;;  %v202_v32 = vld [vmem:[%s2645_s2 + $0x78] sm:$0xff] }
   0xd   :  { %1887 = vmatprep.subr.bf16.mxu1 %v2196_v3  ;;  %1507 = vmatmul.mubr.msk.f32.vlgmr.msra.gmra.mrb[0].mxu0 %vm49_vm1, %v31_v21  ;;  %v2340_v30 = vpack.c.bf16 %v200_v29, %v199_v28  ;;  %v2352_v33 = vpack.c.bf16 %v202_v32, %v201_v31  ;;  %v32_v34 = vld [vmem:[%s2643_s0 + $0x10] sm:$0xff]  ;;  %v33_v35 = vld [vmem:[%s2643_s0 + $0x18] sm:$0xff]  ;;  %v34_v36 = vld [vmem:[%s2643_s0 + $0x20] sm:$0xff] }
   0xe   :  { %1904 = vmatpush3.bf16.msra.mxu0 %v2257_v4  ;;  %1509 = vmatprep.mubr.msk.f32.mxu0 %vm49_vm1, %v32_v34  ;;  %v35_v37 = vld [vmem:[%s2643_s0 + $0x28] sm:$0xff]  ;;  %v36_v38 = vld [vmem:[%s2643_s0 + $0x30] sm:$0xff]  ;;  %v37_v39 = vld [vmem:[%s2643_s0 + $0x38] sm:$0xff] }
   0xf   :  { %1905 = vmatprep.subr.bf16.mxu0 %v2196_v3  ;;  %v2415_v42 = vld [vmem:[%s2646_s3] ss:$0 sm:$0xff]  ;;  %v917_v18 = vld [vmem:[%s2647_s4 + $0x18] sm:$0xff]  ;;  %v919_v22 = vld [vmem:[%s2647_s4 + $0x28] sm:$0xff] }
  0x10   :  { %1889 = vmatpush3.bf16.msra.mxu1 %v2301_v20  ;;  %v918_v21 = vld [vmem:[%s2647_s4 + $0x20] sm:$0xff]  ;;  %v921_v25 = vld [vmem:[%s2647_s4 + $0x38] sm:$0xff]  ;;  %v923_v28 = vld [vmem:[%s2647_s4 + $0x48] sm:$0xff] }
  0x11   :  { %1890 = vmatprep.subr.bf16.mxu1 %v2196_v3  ;;  %1510 = vmatmul.mubr.msk.f32.gmra.mrb[2].mxu0 %vm49_vm1, %v33_v35  ;;  %v2078_v23 = vpack.c.bf16 %v919_v22, %v918_v21  ;;  %v925_v31 = vld [vmem:[%s2647_s4 + $0x58] sm:$0xff]  ;;  %v927_v34 = vld [vmem:[%s2647_s4 + $0x68] sm:$0xff] }
  0x12   :  { %1907 = vmatpush3.bf16.msra.mxu0 %v2265_v7  ;;  %1512 = vmatprep.mubr.msk.f32.mxu0 %vm49_vm1, %v34_v36  ;;  %v928_v36 = vld [vmem:[%s2647_s4 + $0x70] sm:$0xff] }
  0x13   :  { %1908 = vmatprep.subr.bf16.mxu0 %v2196_v3 }
  0x14   :  { %1892 = vmatpush3.bf16.msra.mxu1 %v2316_v24 }
  0x15   :  { %1893 = vmatprep.subr.bf16.mxu1 %v2196_v3  ;;  %1513 = vmatmul.mubr.msk.f32.gmra.mrb[4].mxu0 %vm49_vm1, %v35_v37  ;;  %v929_v37 = vld [vmem:[%s2647_s4 + $0x78] sm:$0xff] }
  0x16   :  { %1910 = vmatpush3.bf16.msra.mxu0 %v2290_v17  ;;  %1515 = vmatprep.mubr.msk.f32.mxu0 %vm49_vm1, %v36_v38  ;;  %v2098_v38 = vpack.c.bf16 %v929_v37, %v928_v36 }
  0x17   :  { %1911 = vmatprep.subr.bf16.mxu0 %v2196_v3 }
  0x18   :  { %1895 = vmatpush3.bf16.msra.mxu1 %v2328_v27 }
  0x19   :  { %1896 = vmatprep.subr.bf16.mxu1 %v2196_v3  ;;  %1516 = vmatmul.mubr.msk.f32.gmra.mrb[6].mxu0 %vm49_vm1, %v37_v39  ;;  %v1050_v39 = vld [vmem:[%s2649_s6] sm:$0xff] }
  0x1a   :  { %1913 = vmatpush3.bf16.msra.mxu0 %v2301_v20  ;;  %1585 = vmatprep.mubr.msk.f32.mxu0 %vm2197_vm0, %v2198_v6 }
  0x1b   :  { %1914 = vmatprep.subr.bf16.mxu0 %v2196_v3 }
  0x1c   :  { %1898 = vmatpush3.bf16.msra.mxu1 %v2340_v30 }
  0x1d   :  { %1899 = vmatprep.subr.bf16.mxu1 %v2196_v3 }
  0x1e   :  { %1916 = vmatpush3.bf16.msra.mxu0 %v2316_v24 }
  0x1f   :  { %1917 = vmatprep.subr.bf16.mxu0 %v2196_v3 }
  0x20   :  { %1901 = vmatpush3.bf16.msra.mxu1 %v2352_v33 }
  0x21   :  { %1926 = vmatprep.subr.bf16.mxu1 %v2196_v3 }
  0x22   :  { %1919 = vmatpush3.bf16.msra.mxu0 %v2328_v27 }
  0x23   :  { %1551 = vmatmul.mubr.f32.vlgmr.msra.gmra.mrb[0].mxu1 %v2198_v6  ;;  %1920 = vmatprep.subr.bf16.mxu0 %v2196_v3 }
  0x24   :  { %1928 = vmatpush3.bf16.msra.mxu1 %v2257_v4  ;;  %1620 = vmatprep.mubr.msk.f32.mxu1 %vm2197_vm0, %v2198_v6 }
  0x25   :  { %1929 = vmatprep.subr.bf16.mxu1 %v2196_v3 }
  0x26   :  { %1922 = vmatpush3.bf16.msra.mxu0 %v2340_v30 }
  0x27   :  { %1923 = vmatprep.subr.bf16.mxu0 %v2196_v3 }
  0x28   :  { %1931 = vmatpush3.bf16.msra.mxu1 %v2265_v7 }
  0x29   :  { %1932 = vmatprep.subr.bf16.mxu1 %v2196_v3 }
  0x2a   :  { %1925 = vmatpush3.bf16.msra.mxu0 %v2352_v33 }
  0x2b   :  { %1950 = vmatprep.subr.bf16.mxu0 %v2196_v3 }
  0x2c   :  { %1934 = vmatpush3.bf16.msra.mxu1 %v2290_v17 }
  0x2d   :  { %1935 = vmatprep.subr.bf16.mxu1 %v2196_v3 }
  0x30   :  { %1937 = vmatpush3.bf16.msra.mxu1 %v2301_v20 }
  0x31   :  { %1938 = vmatprep.subr.bf16.mxu1 %v2196_v3 }
  0x34   :  { %1940 = vmatpush3.bf16.msra.mxu1 %v2316_v24 }
  0x35   :  { %1941 = vmatprep.subr.bf16.mxu1 %v2196_v3 }
  0x38   :  { %1943 = vmatpush3.bf16.msra.mxu1 %v2328_v27 }
  0x39   :  { %1944 = vmatprep.subr.bf16.mxu1 %v2196_v3 }
  0x3c   :  { %1946 = vmatpush3.bf16.msra.mxu1 %v2340_v30 }
  0x3d   :  { %1947 = vmatprep.subr.bf16.mxu1 %v2196_v3 }
  0x40   :  { %1949 = vmatpush3.bf16.msra.mxu1 %v2352_v33 }
  0x41   :  { %1974 = vmatprep.subr.bf16.mxu1 %v2196_v3 }
  0xe0   :  { %v1508_v40 = vpop.f32.mrb[0].mxu0 }
  0xe1   :  { %v140_v41 = vpop.f32.mrb[1].mxu0  ;;  %v146_v54 = vadd.f32 %v1508_v40, %v2415_v42  ;;  %v1051_v40 = vld [vmem:[%s2649_s6 + $0x8] sm:$0xff] }
  0xe2   :  { %v141_v43 = vadd.f32 %v2415_v42, %v140_v41  ;;  %v2102_v41 = vpack.c.bf16 %v1051_v40, %v1050_v39 }
  0xe4   :  { %v1511_v48 = vpop.f32.mrb[2].mxu0 }
  0xe5   :  { %v150_v49 = vpop.f32.mrb[3].mxu0  ;;  %v156_v0 = vadd.f32 %v1511_v48, %v2415_v42  ;;  %v1053_v48 = vld [vmem:[%s2649_s6 + $0x18] sm:$0xff] }
  0xe6   :  { %v151_v59 = vadd.f32 %v2415_v42, %v150_v49 }
  0xe8   :  { %v2439_v50 = vpop.f32.mrb[4].mxu0 }
  0xe9   :  { %v2441_v51 = vpop.f32.mrb[5].mxu0  ;;  %v166_v14 = vadd.f32 %v2439_v50, %v2415_v42 }
  0xea   :  { %v161_v9 = vadd.f32 %v2415_v42, %v2441_v51  ;;  %v1054_v51 = vld [vmem:[%s2649_s6 + $0x20] sm:$0xff] }
  0xec   :  { %v2443_v52 = vpop.f32.mrb[6].mxu0 }
  0xed   :  { %v2445_v53 = vpop.f32.mrb[7].mxu0 }
  0xf6   :  { %v270_v44 = vpop.f32.mrb[0].mxu1 }
  0xf7   :  { %v271_v45 = vadd.f32 %v270_v44, %v141_v43  ;;  %v1552_v46 = vpop.f32.mrb[1].mxu1  ;;  %v171_v43 = vadd.f32 %v2415_v42, %v2445_v53  ;;  %v1055_v53 = vld [vmem:[%s2649_s6 + $0x28] sm:$0xff] }
  0xf9   :  { %2124 = vtanh.f32 %v271_v45 }
 0x103   :  { %v2418_v47 = vpop.eup %2124 }
 0x104   :  { %1586 = vmatmul.mubr.f32.vlgmr.msra.gmra.mrb[8].mxu0 %v2418_v47 }
 0x105   :  { %1952 = vmatpush3.bf16.msra.mxu0 %v2257_v4  ;;  %1655 = vmatprep.mubr.msk.f32.mxu0 %vm2197_vm0, %v2198_v6 }
 0x106   :  { %1953 = vmatprep.subr.bf16.mxu0 %v2196_v3 }
 0x109   :  { %1955 = vmatpush3.bf16.msra.mxu0 %v2265_v7 }
 0x10a   :  { %1956 = vmatprep.subr.bf16.mxu0 %v2196_v3 }
 0x10d   :  { %1958 = vmatpush3.bf16.msra.mxu0 %v2290_v17 }
 0x10e   :  { %1959 = vmatprep.subr.bf16.mxu0 %v2196_v3 }
 0x111   :  { %1961 = vmatpush3.bf16.msra.mxu0 %v2301_v20 }
 0x112   :  { %1962 = vmatprep.subr.bf16.mxu0 %v2196_v3 }
 0x115   :  { %1964 = vmatpush3.bf16.msra.mxu0 %v2316_v24 }
 0x116   :  { %1965 = vmatprep.subr.bf16.mxu0 %v2196_v3 }
 0x119   :  { %1967 = vmatpush3.bf16.msra.mxu0 %v2328_v27 }
 0x11a   :  { %1968 = vmatprep.subr.bf16.mxu0 %v2196_v3 }
 0x11d   :  { %1970 = vmatpush3.bf16.msra.mxu0 %v2340_v30 }
 0x11e   :  { %1971 = vmatprep.subr.bf16.mxu0 %v2196_v3 }
 0x121   :  { %1973 = vmatpush3.bf16.msra.mxu0 %v2352_v33 }
 0x122   :  { %1998 = vmatprep.subr.bf16.mxu0 %v2196_v3 }
 0x1d7   :  { %v360_v55 = vpop.f32.mrb[8].mxu0 }
 0x1d8   :  { %v361_v56 = vadd.f32 %v360_v55, %v146_v54  ;;  %v1587_v57 = vpop.f32.mrb[9].mxu0  ;;  %v2110_v54 = vpack.c.bf16 %v1055_v53, %v1054_v51  ;;  %v1056_v55 = vld [vmem:[%s2649_s6 + $0x30] sm:$0xff] }
 0x1da   :  { %2126 = vtanh.f32 %v361_v56  ;;  %v1057_v56 = vld [vmem:[%s2649_s6 + $0x38] sm:$0xff] }
 0x1db   :  { %v2114_v57 = vpack.c.bf16 %v1057_v56, %v1056_v55 }
 0x1e4   :  { %v2448_v58 = vpop.eup %2126 }
 0x1e5   :  { %1621 = vmatmul.mubr.f32.vlgmr.msra.gmra.mrb[2].mxu1 %v2448_v58 }
 0x1e6   :  { %1976 = vmatpush3.bf16.msra.mxu1 %v2257_v4  ;;  %1690 = vmatprep.mubr.msk.f32.mxu1 %vm2197_vm0, %v2198_v6 }
 0x1e7   :  { %1977 = vmatprep.subr.bf16.mxu1 %v2196_v3 }
 0x1ea   :  { %1979 = vmatpush3.bf16.msra.mxu1 %v2265_v7 }
 0x1eb   :  { %1980 = vmatprep.subr.bf16.mxu1 %v2196_v3 }
 0x1ee   :  { %1982 = vmatpush3.bf16.msra.mxu1 %v2290_v17 }
 0x1ef   :  { %1983 = vmatprep.subr.bf16.mxu1 %v2196_v3 }
 0x1f2   :  { %1985 = vmatpush3.bf16.msra.mxu1 %v2301_v20 }
 0x1f3   :  { %1986 = vmatprep.subr.bf16.mxu1 %v2196_v3 }
 0x1f6   :  { %1988 = vmatpush3.bf16.msra.mxu1 %v2316_v24 }
 0x1f7   :  { %1989 = vmatprep.subr.bf16.mxu1 %v2196_v3 }
 0x1fa   :  { %1991 = vmatpush3.bf16.msra.mxu1 %v2328_v27 }
 0x1fb   :  { %1992 = vmatprep.subr.bf16.mxu1 %v2196_v3 }
 0x1fe   :  { %1994 = vmatpush3.bf16.msra.mxu1 %v2340_v30 }
 0x1ff   :  { %1995 = vmatprep.subr.bf16.mxu1 %v2196_v3 }
 0x202   :  { %1997 = vmatpush3.bf16.msra.mxu1 %v2352_v33 }
 0x203   :  { %2022 = vmatprep.subr.bf16.mxu1 %v2196_v3 }
 0x2b8   :  { %v450_v60 = vpop.f32.mrb[2].mxu1 }
 0x2b9   :  { %v451_v61 = vadd.f32 %v450_v60, %v151_v59  ;;  %v1622_v62 = vpop.f32.mrb[3].mxu1 }
 0x2bb   :  { %2128 = vtanh.f32 %v451_v61 }
 0x2c5   :  { %v2470_v63 = vpop.eup %2128 }
 0x2c6   :  { %1656 = vmatmul.mubr.f32.vlgmr.msra.gmra.mrb[10].mxu0 %v2470_v63 }
 0x2c7   :  { %2000 = vmatpush3.bf16.msra.mxu0 %v2257_v4  ;;  %1725 = vmatprep.mubr.msk.f32.mxu0 %vm2197_vm0, %v2198_v6 }
 0x2c8   :  { %2001 = vmatprep.subr.bf16.mxu0 %v2196_v3 }
 0x2cb   :  { %2003 = vmatpush3.bf16.msra.mxu0 %v2265_v7 }
 0x2cc   :  { %2004 = vmatprep.subr.bf16.mxu0 %v2196_v3 }
 0x2cf   :  { %2006 = vmatpush3.bf16.msra.mxu0 %v2290_v17 }
 0x2d0   :  { %2007 = vmatprep.subr.bf16.mxu0 %v2196_v3 }
 0x2d3   :  { %2009 = vmatpush3.bf16.msra.mxu0 %v2301_v20 }
 0x2d4   :  { %2010 = vmatprep.subr.bf16.mxu0 %v2196_v3 }
 0x2d7   :  { %2012 = vmatpush3.bf16.msra.mxu0 %v2316_v24 }
 0x2d8   :  { %2013 = vmatprep.subr.bf16.mxu0 %v2196_v3 }
 0x2db   :  { %2015 = vmatpush3.bf16.msra.mxu0 %v2328_v27 }
 0x2dc   :  { %2016 = vmatprep.subr.bf16.mxu0 %v2196_v3 }
 0x2df   :  { %2018 = vmatpush3.bf16.msra.mxu0 %v2340_v30 }
 0x2e0   :  { %2019 = vmatprep.subr.bf16.mxu0 %v2196_v3 }
 0x2e3   :  { %2021 = vmatpush3.bf16.msra.mxu0 %v2352_v33 }
 0x2e4   :  { %2046 = vmatprep.subr.bf16.mxu0 %v2196_v3 }
 0x399   :  { %v540_v1 = vpop.f32.mrb[10].mxu0 }
 0x39a   :  { %v541_v2 = vadd.f32 %v540_v1, %v156_v0  ;;  %v1657_v5 = vpop.f32.mrb[11].mxu0 }
 0x39c   :  { %2130 = vtanh.f32 %v541_v2 }
 0x3a6   :  { %v2492_v8 = vpop.eup %2130 }
 0x3a7   :  { %1691 = vmatmul.mubr.f32.vlgmr.msra.gmra.mrb[4].mxu1 %v2492_v8 }
 0x3a8   :  { %2024 = vmatpush3.bf16.msra.mxu1 %v2257_v4  ;;  %1760 = vmatprep.mubr.msk.f32.mxu1 %vm2197_vm0, %v2198_v6 }
 0x3a9   :  { %2025 = vmatprep.subr.bf16.mxu1 %v2196_v3 }
 0x3ac   :  { %2027 = vmatpush3.bf16.msra.mxu1 %v2265_v7 }
 0x3ad   :  { %2028 = vmatprep.subr.bf16.mxu1 %v2196_v3 }
 0x3b0   :  { %2030 = vmatpush3.bf16.msra.mxu1 %v2290_v17 }
 0x3b1   :  { %2031 = vmatprep.subr.bf16.mxu1 %v2196_v3 }
 0x3b4   :  { %2033 = vmatpush3.bf16.msra.mxu1 %v2301_v20 }
 0x3b5   :  { %2034 = vmatprep.subr.bf16.mxu1 %v2196_v3 }
 0x3b8   :  { %2036 = vmatpush3.bf16.msra.mxu1 %v2316_v24 }
 0x3b9   :  { %2037 = vmatprep.subr.bf16.mxu1 %v2196_v3 }
 0x3bc   :  { %2039 = vmatpush3.bf16.msra.mxu1 %v2328_v27 }
 0x3bd   :  { %2040 = vmatprep.subr.bf16.mxu1 %v2196_v3 }
 0x3c0   :  { %2042 = vmatpush3.bf16.msra.mxu1 %v2340_v30 }
 0x3c1   :  { %2043 = vmatprep.subr.bf16.mxu1 %v2196_v3 }
 0x3c4   :  { %2045 = vmatpush3.bf16.msra.mxu1 %v2352_v33 }
 0x47a   :  { %v630_v10 = vpop.f32.mrb[4].mxu1 }
 0x47b   :  { %v631_v11 = vadd.f32 %v630_v10, %v161_v9  ;;  %v1692_v12 = vpop.f32.mrb[5].mxu1 }
 0x47d   :  { %2132 = vtanh.f32 %v631_v11 }
 0x487   :  { %v2514_v13 = vpop.eup %2132 }
 0x488   :  { %1726 = vmatmul.mubr.f32.vlgmr.msra.gmra.mrb[12].mxu0 %v2514_v13 }
 0x489   :  { %2048 = vmatpush3.bf16.msra.mxu0 %v2257_v4  ;;  %1795 = vmatprep.mubr.msk.f32.mxu0 %vm2197_vm0, %v2198_v6  ;;  %v914_v4 = vld [vmem:[%s2647_s4] sm:$0xff]  ;;  %v915_v6 = vld [vmem:[%s2647_s4 + $0x8] sm:$0xff] }
 0x48a   :  { %2049 = vmatprep.subr.bf16.mxu0 %v2196_v3 }
 0x48d   :  { %2051 = vmatpush3.bf16.msra.mxu0 %v2265_v7  ;;  %v2070_v7 = vpack.c.bf16 %v915_v6, %v914_v4 }
 0x48e   :  { %2052 = vmatprep.subr.bf16.mxu0 %v2196_v3 }
 0x48f   :  { %2071 = vmatprep.subr.bf16.mxu1 %v2070_v7 }
 0x491   :  { %2054 = vmatpush3.bf16.msra.mxu0 %v2290_v17 }
 0x492   :  { %2055 = vmatprep.subr.bf16.mxu0 %v2196_v3 }
 0x495   :  { %2057 = vmatpush3.bf16.msra.mxu0 %v2301_v20 }
 0x496   :  { %2058 = vmatprep.subr.bf16.mxu0 %v2196_v3 }
 0x499   :  { %2060 = vmatpush3.bf16.msra.mxu0 %v2316_v24  ;;  %v920_v24 = vld [vmem:[%s2647_s4 + $0x30] sm:$0xff] }
 0x49a   :  { %2061 = vmatprep.subr.bf16.mxu0 %v2196_v3  ;;  %v2082_v26 = vpack.c.bf16 %v921_v25, %v920_v24 }
 0x49d   :  { %2063 = vmatpush3.bf16.msra.mxu0 %v2328_v27  ;;  %v922_v27 = vld [vmem:[%s2647_s4 + $0x40] sm:$0xff] }
 0x49e   :  { %2064 = vmatprep.subr.bf16.mxu0 %v2196_v3  ;;  %v2086_v29 = vpack.c.bf16 %v923_v28, %v922_v27 }
 0x4a1   :  { %2066 = vmatpush3.bf16.msra.mxu0 %v2340_v30  ;;  %v924_v30 = vld [vmem:[%s2647_s4 + $0x50] sm:$0xff] }
 0x4a2   :  { %2067 = vmatprep.subr.bf16.mxu0 %v2196_v3  ;;  %v916_v3 = vld [vmem:[%s2647_s4 + $0x10] sm:$0xff]  ;;  %v2090_v32 = vpack.c.bf16 %v925_v31, %v924_v30 }
 0x4a3   :  { %v2074_v19 = vpack.c.bf16 %v917_v18, %v916_v3  ;;  %v1301_v18 = vld [vmem:[%s2650_s7] ss:$0 sm:$0xff]  ;;  %s2199_s7 = smov [#allocation3]  }
 0x4a4   :  { %s1280_s13 = sshll.u32 %s2199_s7, 4  ;;  %s1281_s13 = int_to_ptr.vmem [resolvable:$true] %s1280_s13 }
 0x4a5   :  { %2069 = vmatpush3.bf16.msra.mxu0 %v2352_v33  ;;  %v926_v33 = vld [vmem:[%s2647_s4 + $0x60] sm:$0xff]  ;;  %s2172_s14 = scalar_lea.vmem %s1281_s13, 1024  ;;  %p2177_p1 = scmp.lt.s32.totalorder %s1281_s13, %s1281_s13 }
 0x4a6   :  { %v2094_v35 = vpack.c.bf16 %v927_v34, %v926_v33  ;;  %2103 = vmatprep.subr.bf16.mxu0 %v2102_v41  ;;  %p2173_p0 = scmp.ne.s32.totalorder %s1281_s13, %s2172_s14  ;;  %p2178_p2 = scmp.lt.s32.totalorder %s2172_s14, %s2172_s14 }
 0x4a8   :  { %p2179_p3 = por %p2178_p2, %p2177_p1 }
 0x4aa   :  { %p2180_p4 = pnand %p2179_p3, %p2173_p0 }
 0x55b   :  { %v720_v15 = vpop.f32.mrb[12].mxu0 }
 0x55c   :  { %v721_v16 = vadd.f32 %v720_v15, %v166_v14  ;;  %v1727_v17 = vpop.f32.mrb[13].mxu0  ;;  %v176_v14 = vadd.f32 %v2443_v52, %v2415_v42 }
 0x55e   :  { %2134 = vtanh.f32 %v721_v16 }
 0x568   :  { %v2135_v20 = vpop.eup %2134 }
 0x569   :  { %1761 = vmatmul.mubr.f32.vlgmr.msra.gmra.mrb[6].mxu1 %v2135_v20 }
 0x56a   :  { %2073 = vmatpush3.bf16.msra.mxu1 %v2070_v7  ;;  %1830 = vmatprep.mubr.f32.mxu1 %v2418_v47  ;;  %v1052_v47 = vld [vmem:[%s2649_s6 + $0x10] sm:$0xff] }
 0x56b   :  { %2075 = vmatprep.subr.bf16.mxu1 %v2074_v19  ;;  %v2106_v49 = vpack.c.bf16 %v1053_v48, %v1052_v47 }
 0x56e   :  { %2077 = vmatpush3.bf16.msra.mxu1 %v2074_v19 }
 0x56f   :  { %2079 = vmatprep.subr.bf16.mxu1 %v2078_v23 }
 0x572   :  { %2081 = vmatpush3.bf16.msra.mxu1 %v2078_v23 }
 0x573   :  { %2083 = vmatprep.subr.bf16.mxu1 %v2082_v26 }
 0x576   :  { %2085 = vmatpush3.bf16.msra.mxu1 %v2082_v26 }
 0x577   :  { %2087 = vmatprep.subr.bf16.mxu1 %v2086_v29 }
 0x57a   :  { %2089 = vmatpush3.bf16.msra.mxu1 %v2086_v29 }
 0x57b   :  { %2091 = vmatprep.subr.bf16.mxu1 %v2090_v32 }
 0x57e   :  { %2093 = vmatpush3.bf16.msra.mxu1 %v2090_v32 }
 0x57f   :  { %2095 = vmatprep.subr.bf16.mxu1 %v2094_v35 }
 0x582   :  { %2097 = vmatpush3.bf16.msra.mxu1 %v2094_v35 }
 0x583   :  { %2099 = vmatprep.subr.bf16.mxu1 %v2098_v38 }
 0x586   :  { %2101 = vmatpush3.bf16.msra.mxu1 %v2098_v38 }
 0x589   :  { %1831 = vmatmul.mubr.f32.vlgmr.msra.gmra.mrb[8].mxu1 %v2448_v58  ;;  %v1300_v58 = vld [vmem:[%s2648_s5] ss:$0 sm:$0xff] }
 0x58a   :  { %1833 = vmatprep.mubr.f32.mxu1 %v2470_v63 }
 0x58d   :  { %1834 = vmatmul.mubr.f32.gmra.mrb[10].mxu1 %v2492_v8 }
 0x58e   :  { %1836 = vmatprep.mubr.f32.mxu1 %v2514_v13 }
 0x591   :  { %1837 = vmatmul.mubr.f32.gmra.mrb[12].mxu1 %v2135_v20 }
 0x63c   :  { %v810_v44 = vpop.f32.mrb[6].mxu1 }
 0x63d   :  { %v811_v45 = vadd.f32 %v810_v44, %v171_v43  ;;  %v1762_v46 = vpop.f32.mrb[7].mxu1 }
 0x63f   :  { %2136 = vtanh.f32 %v811_v45 }
 0x649   :  { %v2137_v50 = vpop.eup %2136 }
 0x64a   :  { %1796 = vmatmul.mubr.f32.vlgmr.msra.gmra.mrb[14].mxu0 %v2137_v50  ;;  %1839 = vmatprep.mubr.f32.mxu1 %v2137_v50 }
 0x64b   :  { %2105 = vmatpush3.bf16.msra.mxu0 %v2102_v41 }
 0x64c   :  { %2107 = vmatprep.subr.bf16.mxu0 %v2106_v49 }
 0x64f   :  { %2109 = vmatpush3.bf16.msra.mxu0 %v2106_v49 }
 0x650   :  { %2111 = vmatprep.subr.bf16.mxu0 %v2110_v54 }
 0x653   :  { %2113 = vmatpush3.bf16.msra.mxu0 %v2110_v54 }
 0x654   :  { %2115 = vmatprep.subr.bf16.mxu0 %v2114_v57 }
 0x657   :  { %2117 = vmatpush3.bf16.msra.mxu0 %v2114_v57 }
 0x65c   :  { %v1832_v59 = vpop.f32.mrb[8].mxu1 }
 0x65d   :  { %v1009_v60 = vadd.f32 %v1832_v59, %v1300_v58  ;;  %v1003_v61 = vpop.f32.mrb[9].mxu1 }
 0x65e   :  { %v1004_v62 = vadd.f32 %v1300_v58, %v1003_v61 }
 0x65f   :  { %v1043_v1 = vmax.f32 %v1009_v60, 0.0 }
 0x660   :  { %v1042_v63 = vmax.f32 %v1004_v62, 0.0  ;;  %v1835_v0 = vpop.f32.mrb[10].mxu1 }
 0x661   :  { %v1019_v2 = vadd.f32 %v1835_v0, %v1300_v58  ;;  %v1013_v5 = vpop.f32.mrb[11].mxu1 }
 0x662   :  { %v1014_v8 = vadd.f32 %v1300_v58, %v1013_v5  ;;  %1858 = vmatprep.mubr.msk.f32.mxu0 %vm1065_vm2, %v1042_v63 }
 0x663   :  { %1859 = vmatmul.mubr.msk.f32.vlgmr.msra.gmra.mrb[16].mxu0 %vm1065_vm2, %v1043_v1  ;;  %v1045_v11 = vmax.f32 %v1019_v2, 0.0 }
 0x664   :  { %v1044_v9 = vmax.f32 %v1014_v8, 0.0  ;;  %v1838_v10 = vpop.f32.mrb[12].mxu1 }
 0x665   :  { %v1029_v12 = vadd.f32 %v1838_v10, %v1300_v58  ;;  %v1023_v13 = vpop.f32.mrb[13].mxu1 }
 0x666   :  { %v1024_v4 = vadd.f32 %v1300_v58, %v1023_v13  ;;  %1861 = vmatprep.mubr.msk.f32.mxu0 %vm1065_vm2, %v1044_v9 }
 0x667   :  { %1862 = vmatmul.mubr.msk.f32.gmra.mrb[18].mxu0 %vm1065_vm2, %v1045_v11  ;;  %v1047_v7 = vmax.f32 %v1029_v12, 0.0 }
 0x668   :  { %v1046_v6 = vmax.f32 %v1024_v4, 0.0 }
 0x66a   :  { %1864 = vmatprep.mubr.msk.f32.mxu0 %vm1065_vm2, %v1046_v6 }
 0x66b   :  { %1865 = vmatmul.mubr.msk.f32.gmra.mrb[20].mxu0 %vm1065_vm2, %v1047_v7 }
 0x71d   :  { %v900_v15 = vpop.f32.mrb[14].mxu0 }
 0x71e   :  { %v901_v16 = vadd.f32 %v900_v15, %v176_v14  ;;  %v1797_v17 = vpop.f32.mrb[15].mxu0 }
 0x720   :  { %2138 = vtanh.f32 %v901_v16 }
 0x72a   :  { %v2139_v3 = vpop.eup %2138 }
 0x72b   :  { %1840 = vmatmul.mubr.f32.gmra.mrb[14].mxu1 %v2139_v3 }
 0x736   :  { %v1860_v19 = vpop.f32.mrb[16].mxu0 }
 0x737   :  { %v1162_v20 = vadd.f32 %v1860_v19, %v1301_v18  ;;  %v1156_v21 = vpop.f32.mrb[17].mxu0 }
 0x738   :  { %v1157_v23 = vadd.f32 %v1301_v18, %v1156_v21 }
 0x739   :  { %1197 = vmax.xlane.f32.xlu0 %v1162_v20 }
 0x73a   :  { %v1863_v22 = vpop.f32.mrb[18].mxu0 }
 0x73b   :  { %v1172_v24 = vadd.f32 %v1863_v22, %v1301_v18  ;;  %v1166_v25 = vpop.f32.mrb[19].mxu0 }
 0x73c   :  { %v1167_v52 = vadd.f32 %v1301_v18, %v1166_v25 }
 0x73d   :  { %1201 = vmax.xlane.f32.xlu1 %v1172_v24  ;;  %1195 = vmax.xlane.f32.xlu0 %v1157_v23 }
 0x73e   :  { %v1866_v42 = vpop.f32.mrb[20].mxu0 }
 0x73f   :  { %v1176_v26 = vpop.f32.mrb[21].mxu0  ;;  %v1182_v28 = vadd.f32 %v1866_v42, %v1301_v18 }
 0x740   :  { %v1177_v27 = vadd.f32 %v1301_v18, %v1176_v26 }
 0x741   :  { %1199 = vmax.xlane.f32.xlu1 %v1167_v52 }
 0x742   :  { %1203 = vmax.xlane.f32.xlu0 %v1177_v27 }
 0x745   :  { %1205 = vmax.xlane.f32.xlu1 %v1182_v28 }
 0x7c6   :  { %v1198_v35 = vpop.xlane.xlu0 %1197 }
 0x7c7   :  { %v1212_v39 = vsub.f32 %v1162_v20, %v1198_v35 }
 0x7c9   :  { %v1221_v41 = vmul.f32 1.442695, %v1212_v39 }
 0x7ca   :  { %v1202_v36 = vpop.xlane.xlu1 %1201  ;;  %v1196_v37 = vpop.xlane.xlu0 %1195 }
 0x7cb   :  { %v1211_v40 = vsub.f32 %v1157_v23, %v1196_v37  ;;  %v1214_v43 = vsub.f32 %v1172_v24, %v1202_v36  ;;  %2140 = vpow2.f32 %v1221_v41 }
 0x7cd   :  { %v1219_v44 = vmul.f32 1.442695, %v1211_v40  ;;  %v1225_v48 = vmul.f32 1.442695, %v1214_v43 }
 0x7ce   :  { %v1200_v38 = vpop.xlane.xlu1 %1199 }
 0x7cf   :  { %v1213_v45 = vsub.f32 %v1167_v52, %v1200_v38  ;;  %v1204_v47 = vpop.xlane.xlu0 %1203  ;;  %2142 = vpow2.f32 %v1219_v44 }
 0x7d0   :  { %v1215_v51 = vsub.f32 %v1177_v27, %v1204_v47  ;;  %2144 = vpow2.f32 %v1225_v48 }
 0x7d1   :  { %v1223_v50 = vmul.f32 1.442695, %v1213_v45 }
 0x7d2   :  { %v1206_v46 = vpop.xlane.xlu1 %1205  ;;  %v1227_v55 = vmul.f32 1.442695, %v1215_v51 }
 0x7d3   :  { %v1216_v49 = vsub.f32 %v1182_v28, %v1206_v46  ;;  %2146 = vpow2.f32 %v1223_v50 }
 0x7d5   :  { %v1229_v53 = vmul.f32 1.442695, %v1216_v49  ;;  %v2141_v59 = vpop.eup %2140 }
 0x7d7   :  { %2148 = vpow2.f32 %v1229_v53 }
 0x7d8   :  { %2150 = vpow2.f32 %v1227_v55 }
 0x7d9   :  { %v2143_v60 = vpop.eup %2142 }
 0x7da   :  { %v2145_v61 = vpop.eup %2144 }
 0x7dd   :  { %v2147_v62 = vpop.eup %2146 }
 0x7e1   :  { %v2149_v63 = vpop.eup %2148 }
 0x7e2   :  { %v2151_v0 = vpop.eup %2150 }
 0x7fe   :  { %v1841_v29 = vpop.f32.mrb[14].mxu1 }
 0x7ff   :  { %v1039_v30 = vadd.f32 %v1841_v29, %v1300_v58  ;;  %v1033_v31 = vpop.f32.mrb[15].mxu1 }
 0x800   :  { %v1034_v32 = vadd.f32 %v1300_v58, %v1033_v31 }
 0x801   :  { %v1049_v34 = vmax.f32 %v1039_v30, 0.0 }
 0x802   :  { %v1048_v33 = vmax.f32 %v1034_v32, 0.0 }
 0x804   :  { %1867 = vmatprep.mubr.msk.f32.mxu0 %vm1065_vm2, %v1048_v33 }
 0x805   :  { %1868 = vmatmul.mubr.msk.f32.gmra.mrb[22].mxu0 %vm1065_vm2, %v1049_v34 }
 0x8d8   :  { %v1869_v54 = vpop.f32.mrb[22].mxu0 }
 0x8d9   :  { %v1192_v56 = vadd.f32 %v1869_v54, %v1301_v18  ;;  %v1186_v57 = vpop.f32.mrb[23].mxu0 }
 0x8da   :  { %v1187_v58 = vadd.f32 %v1301_v18, %v1186_v57 }
 0x8db   :  { %1209 = vmax.xlane.f32.xlu1 %v1192_v56 }
 0x8dc   :  { %1207 = vmax.xlane.f32.xlu0 %v1187_v58 }
 0x8df   :  { %1237 = vadd.xlane.f32.xlu1 %v2141_v59 }
 0x8e0   :  { %1235 = vadd.xlane.f32.xlu0 %v2143_v60 }
 0x8e3   :  { %1241 = vadd.xlane.f32.xlu1 %v2145_v61 }
 0x8e4   :  { %1239 = vadd.xlane.f32.xlu0 %v2147_v62 }
 0x8e7   :  { %1245 = vadd.xlane.f32.xlu1 %v2149_v63 }
 0x8e8   :  { %1243 = vadd.xlane.f32.xlu0 %v2151_v0 }
 0x968   :  { %v1210_v1 = vpop.xlane.xlu1 %1209 }
 0x969   :  { %v1218_v2 = vsub.f32 %v1192_v56, %v1210_v1  ;;  %v1208_v5 = vpop.xlane.xlu0 %1207 }
 0x96a   :  { %v1217_v8 = vsub.f32 %v1187_v58, %v1208_v5 }
 0x96b   :  { %v1233_v9 = vmul.f32 1.442695, %v1218_v2 }
 0x96c   :  { %v1231_v10 = vmul.f32 1.442695, %v1217_v8  ;;  %v1238_v11 = vpop.xlane.xlu1 %1237 }
 0x96d   :  { %2152 = vpow2.f32 %v1233_v9  ;;  %v1236_v12 = vpop.xlane.xlu0 %1235 }
 0x96e   :  { %2154 = vpow2.f32 %v1231_v10 }
 0x96f   :  { %2156 = vrcp.f32 %v1238_v11 }
 0x970   :  { %2158 = vrcp.f32 %v1236_v12  ;;  %v1242_v13 = vpop.xlane.xlu1 %1241 }
 0x971   :  { %2160 = vrcp.f32 %v1242_v13  ;;  %v1240_v4 = vpop.xlane.xlu0 %1239 }
 0x972   :  { %2162 = vrcp.f32 %v1240_v4 }
 0x974   :  { %v1246_v6 = vpop.xlane.xlu1 %1245 }
 0x975   :  { %2164 = vrcp.f32 %v1246_v6  ;;  %v1244_v7 = vpop.xlane.xlu0 %1243 }
 0x976   :  { %2166 = vrcp.f32 %v1244_v7 }
 0x977   :  { %v2153_v14 = vpop.eup %2152 }
 0x978   :  { %v2155_v15 = vpop.eup %2154  ;;  %1249 = vadd.xlane.f32.xlu1 %v2153_v14 }
 0x979   :  { %v2157_v16 = vpop.eup %2156  ;;  %1247 = vadd.xlane.f32.xlu0 %v2155_v15 }
 0x97a   :  { %v2159_v17 = vpop.eup %2158  ;;  %v1254_v3 = vmul.f32 %v2157_v16, %v2141_v59 }
 0x97b   :  { %v2161_v18 = vpop.eup %2160  ;;  %v1252_v19 = vmul.f32 %v2159_v17, %v2143_v60 }
 0x97c   :  { %v2163_v20 = vpop.eup %2162  ;;  %1268 = vst [vmem:[#allocation3 + $0x8] sm:$0xff] %v1254_v3  ;;  %v1258_v21 = vmul.f32 %v2161_v18, %v2145_v61 }
 0x97d   :  { %1267 = vst [vmem:[#allocation3] sm:$0xff] %v1252_v19  ;;  %v1256_v22 = vmul.f32 %v2163_v20, %v2147_v62 }
 0x97e   :  { %1270 = vst [vmem:[#allocation3 + $0x18] sm:$0xff] %v1258_v21 }
 0x97f   :  { %v2165_v23 = vpop.eup %2164  ;;  %1269 = vst [vmem:[#allocation3 + $0x10] sm:$0xff] %v1256_v22 }
 0x980   :  { %v2167_v24 = vpop.eup %2166  ;;  %v1262_v25 = vmul.f32 %v2165_v23, %v2149_v63 }
 0x981   :  { %v1260_v42 = vmul.f32 %v2167_v24, %v2151_v0 }
 0x982   :  { %1272 = vst [vmem:[#allocation3 + $0x28] sm:$0xff] %v1262_v25 }
 0x983   :  { %1271 = vst [vmem:[#allocation3 + $0x20] sm:$0xff] %v1260_v42 }
 0xa05   :  { %v1250_v52 = vpop.xlane.xlu1 %1249 }
 0xa06   :  { %2168 = vrcp.f32 %v1250_v52  ;;  %v1248_v26 = vpop.xlane.xlu0 %1247 }
 0xa07   :  { %2170 = vrcp.f32 %v1248_v26 }
 0xa10   :  { %v2169_v27 = vpop.eup %2168 }
 0xa11   :  { %v2171_v28 = vpop.eup %2170  ;;  %v1266_v29 = vmul.f32 %v2169_v27, %v2153_v14 }
 0xa12   :  { %v1264_v30 = vmul.f32 %v2171_v28, %v2155_v15 }
 0xa13   :  { %1274 = vst [vmem:[#allocation3 + $0x38] sm:$0xff] %v1266_v29 }
 0xa14   :  { %1273 = vst [vmem:[#allocation3 + $0x30] sm:$0xff] %v1264_v30 }
 0xa15   :  { %2183 = shalt.err (!%p2180_p4)
}
 0xa16   :  { %s2184_s3 = scalar_lea.hbm %s2651_s8, 1024 }
 0xa17   :  { %p2185_p5 = scmp.ne.s32.totalorder %s2651_s8, %s2184_s3  ;;  %p2188_p6 = scmp.lt.u32.totalorder %s2184_s3, %s2651_s8 }
 0xa19   :  { %p2190_p7 = pnand %p2188_p6, %p2185_p5 }
 0xa1b   :  { %2193 = shalt.err (!%p2190_p7)
}
 0xa1c   :  { %s2200_s20 = smov 128   ;;  %s2201_s21 = smov 8  }
 0xa1d   :  { %1286 = dma.vmem_to_hbm [thread:$0]  %s1281_s13, 1024, %s2651_s8, [#allocation4], %s2200_s20, %s2200_s20, %s2201_s21  }
 0xa1e   :  { %2194 = dma.done.wait [#allocation4], 1024  }
 0xa1f   :  { %2195 = vsyncadd [#allocation4], 4294966272 }
 0xa20   :  { %1290 = vsyncpa [#allocation4], 1 }

</bundles_post_ra>
